<compile_context>
chip_gen: v6e
topology: v6e:2x2x1
jax: 0.10.0
libtpu: 0.0.40
codegen_flags: <defaults>
</compile_context>

<pallas_src>
import functools

import jax
import jax.numpy as jnp
from jax.experimental import pallas as pl
from jax.experimental.pallas import tpu as pltpu


def _round_up(x, m):
    return ((x + m - 1) // m) * m


def _actor_mean_kernel(x_ref, w1_ref, b1_ref, w2_ref, b2_ref, w3_ref, b3_ref,
                       ma_ref, mean_ref):
    # mean_net: Linear -> Tanh -> Linear -> Tanh -> Linear -> Tanh, * max_action.
    # All matmuls accumulate in f32 on the MXU; tanh goes to the EUP.
    x = x_ref[...]                                                    # [tb, obs]
    h1 = jnp.tanh(jnp.dot(x, w1_ref[...],
                          preferred_element_type=jnp.float32) + b1_ref[...])
    h2 = jnp.tanh(jnp.dot(h1, w2_ref[...],
                          preferred_element_type=jnp.float32) + b2_ref[...])
    m = jnp.tanh(jnp.dot(h2, w3_ref[...],
                         preferred_element_type=jnp.float32) + b3_ref[...])
    mean_ref[...] = (m * ma_ref[...]).astype(mean_ref.dtype)          # [tb, Ap]


@functools.partial(jax.jit, static_argnames=("tile_b",))
def actor_forward(x, params, tile_b=1024):
    """Returns (mean, scale_tril) of the MultivariateNormal policy."""
    B, obs_dim = x.shape
    hidden = params["w1"].shape[1]
    A = params["w3"].shape[1]

    # Lane-dense output width (multiple of 128) so stores are unmasked.
    A_pad = max(_round_up(A, 128), 128)
    # Batch tile: multiple of 8 sublanes, capped so small batches take 1 step.
    tb = min(tile_b, _round_up(B, 8))
    B_pad = _round_up(B, tb)

    # Pad batch rows and last-layer output columns with zeros so every block
    # is full.  (No-op pads are elided by XLA when shapes already match.)
    x_p = jnp.pad(x, ((0, B_pad - B), (0, 0)))
    w3_p = jnp.pad(params["w3"], ((0, 0), (0, A_pad - A)))
    b3_p = jnp.pad(params["b3"].reshape(1, A), ((0, 0), (0, A_pad - A)))
    ma_p = jnp.pad(params["max_action"].reshape(1, A),
                   ((0, 0), (0, A_pad - A)))
    b1 = params["b1"].reshape(1, hidden)
    b2 = params["b2"].reshape(1, hidden)

    grid = (B_pad // tb,)
    mean_padded = pl.pallas_call(
        _actor_mean_kernel,
        out_shape=jax.ShapeDtypeStruct((B_pad, A_pad), jnp.float32),
        grid=grid,
        in_specs=[
            pl.BlockSpec((tb, obs_dim), lambda i: (i, 0)),        # x tile
            pl.BlockSpec((obs_dim, hidden), lambda i: (0, 0)),    # w1 (resident)
            pl.BlockSpec((1, hidden), lambda i: (0, 0)),          # b1
            pl.BlockSpec((hidden, hidden), lambda i: (0, 0)),     # w2
            pl.BlockSpec((1, hidden), lambda i: (0, 0)),          # b2
            pl.BlockSpec((hidden, A_pad), lambda i: (0, 0)),      # w3 (padded)
            pl.BlockSpec((1, A_pad), lambda i: (0, 0)),           # b3 (padded)
            pl.BlockSpec((1, A_pad), lambda i: (0, 0)),           # max_action
        ],
        out_specs=pl.BlockSpec((tb, A_pad), lambda i: (i, 0)),
        compiler_params=pltpu.CompilerParams(
            dimension_semantics=("parallel",),
            vmem_limit_bytes=32 * 1024 * 1024,
        ),
    )(x_p, params["w1"], b1, params["w2"], b2, w3_p, b3_p, ma_p)

    mean = mean_padded[:B, :A]

    # scale_tril = diag(exp(std)) repeated over batch -- batch-independent,
    # computed outside the kernel to avoid redundant HBM writeback.
    scale_tril_single = jnp.diag(jnp.exp(params["std"].reshape(-1)))
    scale_tril = jnp.broadcast_to(scale_tril_single[None], (B, A, A))
    return mean, scale_tril


def _orthogonal(key, shape, gain):
    """Deterministic orthogonal init (matches nn.init.orthogonal_ semantics)."""
    rows, cols = shape
    n = max(rows, cols)
    a = jax.random.normal(key, (n, n), dtype=jnp.float32)
    q, r = jnp.linalg.qr(a)
    q = q * jnp.sign(jnp.diag(r))[None, :]   # sign fix for uniqueness
    return gain * q[:rows, :cols]


def init_actor_params(key, obs_dim, act_dim, max_action, hidden_dim=128):
    k1, k2, k3 = jax.random.split(key, 3)
    gain = jnp.sqrt(2.0)
    # torch Linear weight is [out, in]; we store [in, out] so the kernel does
    # x @ W.  Orthogonality is preserved under transpose.
    return {
        "w1": _orthogonal(k1, (obs_dim, hidden_dim), gain),
        "b1": jnp.zeros((hidden_dim,), jnp.float32),
        "w2": _orthogonal(k2, (hidden_dim, hidden_dim), gain),
        "b2": jnp.zeros((hidden_dim,), jnp.float32),
        "w3": _orthogonal(k3, (hidden_dim, act_dim), gain),
        "b3": jnp.zeros((act_dim,), jnp.float32),
        "std": jnp.zeros((act_dim,), jnp.float32),        # nn.Parameter(zeros)
        "max_action": jnp.asarray(max_action, jnp.float32).reshape(act_dim),
    }


def actor_forward_ref(x, params):
    """Pure-JAX reference for correctness checking."""
    h1 = jnp.tanh(x @ params["w1"] + params["b1"][None, :])
    h2 = jnp.tanh(h1 @ params["w2"] + params["b2"][None, :])
    m = jnp.tanh(h2 @ params["w3"] + params["b3"][None, :])
    mean = m * params["max_action"][None, :]
    scale_tril_single = jnp.diag(jnp.exp(params["std"]))
    scale_tril = jnp.broadcast_to(
        scale_tril_single[None], (x.shape[0],) + scale_tril_single.shape)
    return mean, scale_tril


# TODO(synk): torch.distributions.MultivariateNormal object itself has no
# Pallas equivalent; we return (mean, scale_tril) which parameterize it exactly.

if __name__ == "__main__":
    obs_dim, act_dim, hidden_dim, batch = 16, 8, 128, 8

    key = jax.random.PRNGKey(0)
    k_param, k_x = jax.random.split(key)

    max_action = jnp.full((act_dim,), 2.0, jnp.float32)
    params = init_actor_params(k_param, obs_dim, act_dim, max_action, hidden_dim)

    x = jax.random.normal(k_x, (batch, obs_dim), dtype=jnp.float32)

    mean, scale_tril = actor_forward(x, params)
    jax.block_until_ready((mean, scale_tril))

    mean_ref, tril_ref = actor_forward_ref(x, params)
    assert mean.shape == (batch, act_dim)
    assert scale_tril.shape == (batch, act_dim, act_dim)
    assert jnp.allclose(mean, mean_ref, atol=1e-5, rtol=1e-5)
    assert jnp.allclose(scale_tril, tril_ref, atol=1e-6, rtol=1e-6)

    # Also exercise the multi-step tiled path with a non-multiple batch size.
    x_big = jax.random.normal(jax.random.PRNGKey(1), (1000, obs_dim), jnp.float32)
    mean_big, tril_big = actor_forward(x_big, params, tile_b=256)
    jax.block_until_ready((mean_big, tril_big))
    mean_big_ref, tril_big_ref = actor_forward_ref(x_big, params)
    assert jnp.allclose(mean_big, mean_big_ref, atol=1e-5, rtol=1e-5)
    assert jnp.allclose(tril_big, tril_big_ref, atol=1e-6, rtol=1e-6)

    print("KERNEL_OK")
</pallas_src>

<mosaic_0001>
module attributes {stable_mosaic.version = 11 : i64} {
  func.func @_actor_mean_kernel(%arg0: i32, %arg1: memref<8x16xf32, #tpu.memory_space<vmem>>, %arg2: memref<16x128xf32, #tpu.memory_space<vmem>>, %arg3: memref<1x128xf32, #tpu.memory_space<vmem>>, %arg4: memref<128x128xf32, #tpu.memory_space<vmem>>, %arg5: memref<1x128xf32, #tpu.memory_space<vmem>>, %arg6: memref<128x128xf32, #tpu.memory_space<vmem>>, %arg7: memref<1x128xf32, #tpu.memory_space<vmem>>, %arg8: memref<1x128xf32, #tpu.memory_space<vmem>>, %arg9: memref<8x128xf32, #tpu.memory_space<vmem>>) attributes {dimension_semantics = [#tpu.dimension_semantics<parallel>], iteration_bounds = array<i64: 1>, scalar_prefetch = 0 : i64, scratch_operands = 0 : i64, tpu.core_type = #tpu.core_type<tc>, window_params = [{transform_indices = @transform_0, window_bounds = array<i64: 8, 16>}, {pipeline_mode = #tpu.pipeline_mode<synchronous>, transform_indices = @transform_1, window_bounds = array<i64: 16, 128>}, {pipeline_mode = #tpu.pipeline_mode<synchronous>, transform_indices = @transform_2, window_bounds = array<i64: 1, 128>}, {pipeline_mode = #tpu.pipeline_mode<synchronous>, transform_indices = @transform_3, window_bounds = array<i64: 128, 128>}, {pipeline_mode = #tpu.pipeline_mode<synchronous>, transform_indices = @transform_4, window_bounds = array<i64: 1, 128>}, {pipeline_mode = #tpu.pipeline_mode<synchronous>, transform_indices = @transform_5, window_bounds = array<i64: 128, 128>}, {pipeline_mode = #tpu.pipeline_mode<synchronous>, transform_indices = @transform_6, window_bounds = array<i64: 1, 128>}, {pipeline_mode = #tpu.pipeline_mode<synchronous>, transform_indices = @transform_7, window_bounds = array<i64: 1, 128>}, {transform_indices = @transform_8, window_bounds = array<i64: 8, 128>}]} {
    %c0 = arith.constant 0 : index
    %c0_0 = arith.constant 0 : index
    %0 = vector.load %arg1[%c0, %c0_0] : memref<8x16xf32, #tpu.memory_space<vmem>>, vector<8x16xf32>
    %c0_1 = arith.constant 0 : index
    %c0_2 = arith.constant 0 : index
    %1 = vector.load %arg2[%c0_1, %c0_2] : memref<16x128xf32, #tpu.memory_space<vmem>>, vector<16x128xf32>
    %cst = arith.constant dense<0.000000e+00> : vector<8x128xf32>
    %2 = tpu.matmul %0, %1, %cst {dimension_numbers = #tpu.dot_dimension_numbers<[1], [0], [0], [1], [0, 0, 1, 1], [], []>} : vector<8x16xf32>, vector<16x128xf32>, vector<8x128xf32> -> vector<8x128xf32>
    %c0_3 = arith.constant 0 : index
    %c0_4 = arith.constant 0 : index
    %3 = vector.load %arg3[%c0_3, %c0_4] : memref<1x128xf32, #tpu.memory_space<vmem>>, vector<1x128xf32>
    %4 = vector.broadcast %3 : vector<1x128xf32> to vector<8x128xf32>
    %5 = arith.addf %2, %4 : vector<8x128xf32>
    %6 = math.tanh %5 : vector<8x128xf32>
    %c0_5 = arith.constant 0 : index
    %c0_6 = arith.constant 0 : index
    %7 = vector.load %arg4[%c0_5, %c0_6] : memref<128x128xf32, #tpu.memory_space<vmem>>, vector<128x128xf32>
    %cst_7 = arith.constant dense<0.000000e+00> : vector<8x128xf32>
    %8 = tpu.matmul %6, %7, %cst_7 {dimension_numbers = #tpu.dot_dimension_numbers<[1], [0], [0], [1], [0, 0, 1, 1], [], []>} : vector<8x128xf32>, vector<128x128xf32>, vector<8x128xf32> -> vector<8x128xf32>
    %c0_8 = arith.constant 0 : index
    %c0_9 = arith.constant 0 : index
    %9 = vector.load %arg5[%c0_8, %c0_9] : memref<1x128xf32, #tpu.memory_space<vmem>>, vector<1x128xf32>
    %10 = vector.broadcast %9 : vector<1x128xf32> to vector<8x128xf32>
    %11 = arith.addf %8, %10 : vector<8x128xf32>
    %12 = math.tanh %11 : vector<8x128xf32>
    %c0_10 = arith.constant 0 : index
    %c0_11 = arith.constant 0 : index
    %13 = vector.load %arg6[%c0_10, %c0_11] : memref<128x128xf32, #tpu.memory_space<vmem>>, vector<128x128xf32>
    %cst_12 = arith.constant dense<0.000000e+00> : vector<8x128xf32>
    %14 = tpu.matmul %12, %13, %cst_12 {dimension_numbers = #tpu.dot_dimension_numbers<[1], [0], [0], [1], [0, 0, 1, 1], [], []>} : vector<8x128xf32>, vector<128x128xf32>, vector<8x128xf32> -> vector<8x128xf32>
    %c0_13 = arith.constant 0 : index
    %c0_14 = arith.constant 0 : index
    %15 = vector.load %arg7[%c0_13, %c0_14] : memref<1x128xf32, #tpu.memory_space<vmem>>, vector<1x128xf32>
    %16 = vector.broadcast %15 : vector<1x128xf32> to vector<8x128xf32>
    %17 = arith.addf %14, %16 : vector<8x128xf32>
    %18 = math.tanh %17 : vector<8x128xf32>
    %c0_15 = arith.constant 0 : index
    %c0_16 = arith.constant 0 : index
    %19 = vector.load %arg8[%c0_15, %c0_16] : memref<1x128xf32, #tpu.memory_space<vmem>>, vector<1x128xf32>
    %20 = vector.broadcast %19 : vector<1x128xf32> to vector<8x128xf32>
    %21 = arith.mulf %18, %20 : vector<8x128xf32>
    %c0_17 = arith.constant 0 : index
    %c0_18 = arith.constant 0 : index
    %22 = vector.load %arg9[%c0_17, %c0_18] : memref<8x128xf32, #tpu.memory_space<vmem>>, vector<8x128xf32>
    tpu.vector_store %arg9[%c0_17, %c0_18], %21 {strides = array<i32>} : memref<8x128xf32, #tpu.memory_space<vmem>>, vector<8x128xf32>,
    return
  }
  func.func @transform_0(%arg0: i32) -> (i32, i32) {
    %c0_i32 = arith.constant 0 : i32
    %c0_i32_0 = arith.constant 0 : i32
    return %arg0, %c0_i32 : i32, i32
  }
  func.func @transform_1(%arg0: i32) -> (i32, i32) {
    %c0_i32 = arith.constant 0 : i32
    %c0_i32_0 = arith.constant 0 : i32
    %c0_i32_1 = arith.constant 0 : i32
    return %c0_i32, %c0_i32_0 : i32, i32
  }
  func.func @transform_2(%arg0: i32) -> (i32, i32) {
    %c0_i32 = arith.constant 0 : i32
    %c0_i32_0 = arith.constant 0 : i32
    %c0_i32_1 = arith.constant 0 : i32
    return %c0_i32, %c0_i32_0 : i32, i32
  }
  func.func @transform_3(%arg0: i32) -> (i32, i32) {
    %c0_i32 = arith.constant 0 : i32
    %c0_i32_0 = arith.constant 0 : i32
    %c0_i32_1 = arith.constant 0 : i32
    return %c0_i32, %c0_i32_0 : i32, i32
  }
  func.func @transform_4(%arg0: i32) -> (i32, i32) {
    %c0_i32 = arith.constant 0 : i32
    %c0_i32_0 = arith.constant 0 : i32
    %c0_i32_1 = arith.constant 0 : i32
    return %c0_i32, %c0_i32_0 : i32, i32
  }
  func.func @transform_5(%arg0: i32) -> (i32, i32) {
    %c0_i32 = arith.constant 0 : i32
    %c0_i32_0 = arith.constant 0 : i32
    %c0_i32_1 = arith.constant 0 : i32
    return %c0_i32, %c0_i32_0 : i32, i32
  }
  func.func @transform_6(%arg0: i32) -> (i32, i32) {
    %c0_i32 = arith.constant 0 : i32
    %c0_i32_0 = arith.constant 0 : i32
    %c0_i32_1 = arith.constant 0 : i32
    return %c0_i32, %c0_i32_0 : i32, i32
  }
  func.func @transform_7(%arg0: i32) -> (i32, i32) {
    %c0_i32 = arith.constant 0 : i32
    %c0_i32_0 = arith.constant 0 : i32
    %c0_i32_1 = arith.constant 0 : i32
    return %c0_i32, %c0_i32_0 : i32, i32
  }
  func.func @transform_8(%arg0: i32) -> (i32, i32) {
    %c0_i32 = arith.constant 0 : i32
    %c0_i32_0 = arith.constant 0 : i32
    return %arg0, %c0_i32 : i32, i32
  }
}

</mosaic_0001>

<bundles_post_ra>
// kernel: actor_forward.1
= control target key start
LH: loop header
LB: loop body
LE: loop exit
PB: predicated region body
PF: predicated region fallthrough
CT: control target
= control target key end

     0   :  { %v476_v1 = vmov 0.0   ;;  %vm477_vm0 = vmmov 0   ;;  %vm40_vm1 = vcmask 130048   ;;  %s684_s0 = inlined_call_operand.vmem [shape: f32[8,16], index: 0, kind: input, shape index: {}]   ;;  %s685_s1 = inlined_call_operand.vmem [shape: f32[16,128], index: 1, kind: input, shape index: {}]   ;;  %s686_s2 = inlined_call_operand.vmem [shape: f32[1,128], index: 2, kind: input, shape index: {}]   ;;  %s687_s3 = inlined_call_operand.vmem [shape: f32[128,128], index: 3, kind: input, shape index: {}]   ;;  %s688_s4 = inlined_call_operand.vmem [shape: f32[1,128], index: 4, kind: input, shape index: {}]   ;;  %s689_s5 = inlined_call_operand.vmem [shape: f32[128,128], index: 5, kind: input, shape index: {}]   ;;  %s690_s6 = inlined_call_operand.vmem [shape: f32[1,128], index: 6, kind: input, shape index: {}]   ;;  %s691_s7 = inlined_call_operand.vmem [shape: f32[1,128], index: 7, kind: input, shape index: {}]   ;;  %s692_s8 = inlined_call_operand.hbm [shape: f32[8,128], index: 8, kind: output, shape index: {}]  }
   0x1   :  { %v32_v0 = vld [vmem:[%s685_s1 + $0x8] sm:$0xff]  ;;  %368 = vmatprep.subr.mxu0 %v476_v1  ;;  %v31_v2 = vld [vmem:[%s685_s1] sm:$0xff]  ;;  %372 = vmatprep.mubr.msk.f32.mxu0 %vm477_vm0, %v476_v1  ;;  %v130_v3 = vld [vmem:[%s687_s3 + $0x78] sm:$0xff] }
   0x2   :  { %369 = vmatpush3.msra.mxu0 %v32_v0  ;;  %v30_v4 = vld [vmem:[%s684_s0] sm:$0xff]  ;;  %375 = vmatprep.subr.mxu1 %v476_v1  ;;  %v129_v5 = vld [vmem:[%s687_s3 + $0x70] sm:$0xff] }
   0x3   :  { %370 = vmatprep.subr.mxu0 %v476_v1  ;;  %376 = vmatpush3.msra.mxu1 %v130_v3 }
   0x4   :  { %13 = vsyncpa [#allocation3], 0  ;;  %371 = vmatpush3.msra.mxu0 %v31_v2  ;;  %377 = vmatprep.subr.mxu1 %v476_v1  ;;  %v128_v6 = vld [vmem:[%s687_s3 + $0x68] sm:$0xff]  ;;  %v127_v7 = vld [vmem:[%s687_s3 + $0x60] sm:$0xff]  ;;  %s478_s29 = smov [#allocation2]  }
   0x5   :  { %373 = vmatmul.mubr.msk.f32.vlgmr.msra.gmra.mxu0 %vm40_vm1, %v30_v4  ;;  %378 = vmatpush3.msra.mxu1 %v129_v5  ;;  %v126_v8 = vld [vmem:[%s687_s3 + $0x58] sm:$0xff]  ;;  %v125_v9 = vld [vmem:[%s687_s3 + $0x50] sm:$0xff]  ;;  %v124_v10 = vld [vmem:[%s687_s3 + $0x48] sm:$0xff] }
   0x6   :  { %379 = vmatprep.subr.mxu1 %v476_v1  ;;  %407 = vmatprep.mubr.msk.f32.mxu1 %vm477_vm0, %v476_v1  ;;  %v123_v11 = vld [vmem:[%s687_s3 + $0x40] sm:$0xff]  ;;  %v122_v12 = vld [vmem:[%s687_s3 + $0x38] sm:$0xff]  ;;  %v121_v13 = vld [vmem:[%s687_s3 + $0x30] sm:$0xff] }
   0x7   :  { %380 = vmatpush3.msra.mxu1 %v128_v6  ;;  %410 = vmatprep.subr.mxu0 %v476_v1  ;;  %v120_v14 = vld [vmem:[%s687_s3 + $0x28] sm:$0xff]  ;;  %v119_v15 = vld [vmem:[%s687_s3 + $0x20] sm:$0xff]  ;;  %v118_v16 = vld [vmem:[%s687_s3 + $0x18] sm:$0xff] }
   0x8   :  { %381 = vmatprep.subr.mxu1 %v476_v1  ;;  %442 = vmatprep.mubr.msk.f32.mxu0 %vm477_vm0, %v476_v1  ;;  %v117_v17 = vld [vmem:[%s687_s3 + $0x10] sm:$0xff]  ;;  %v116_v18 = vld [vmem:[%s687_s3 + $0x8] sm:$0xff]  ;;  %v115_v19 = vld [vmem:[%s687_s3] sm:$0xff] }
   0x9   :  { %382 = vmatpush3.msra.mxu1 %v127_v7  ;;  %v224_v20 = vld [vmem:[%s689_s5 + $0x78] sm:$0xff]  ;;  %v223_v21 = vld [vmem:[%s689_s5 + $0x70] sm:$0xff]  ;;  %v222_v22 = vld [vmem:[%s689_s5 + $0x68] sm:$0xff] }
   0xa   :  { %383 = vmatprep.subr.mxu1 %v476_v1  ;;  %411 = vmatpush3.msra.mxu0 %v224_v20  ;;  %v221_v23 = vld [vmem:[%s689_s5 + $0x60] sm:$0xff]  ;;  %v220_v24 = vld [vmem:[%s689_s5 + $0x58] sm:$0xff]  ;;  %v219_v25 = vld [vmem:[%s689_s5 + $0x50] sm:$0xff] }
   0xb   :  { %384 = vmatpush3.msra.mxu1 %v126_v8  ;;  %412 = vmatprep.subr.mxu0 %v476_v1  ;;  %v218_v26 = vld [vmem:[%s689_s5 + $0x48] sm:$0xff]  ;;  %v326_v27 = vld [vmem:[%s686_s2] ss:$0 sm:$0xff]  ;;  %v216_v33 = vld [vmem:[%s689_s5 + $0x38] sm:$0xff] }
   0xc   :  { %385 = vmatprep.subr.mxu1 %v476_v1  ;;  %413 = vmatpush3.msra.mxu0 %v223_v21  ;;  %v217_v32 = vld [vmem:[%s689_s5 + $0x40] sm:$0xff]  ;;  %v215_v34 = vld [vmem:[%s689_s5 + $0x30] sm:$0xff]  ;;  %v214_v35 = vld [vmem:[%s689_s5 + $0x28] sm:$0xff] }
   0xd   :  { %386 = vmatpush3.msra.mxu1 %v125_v9  ;;  %414 = vmatprep.subr.mxu0 %v476_v1  ;;  %v213_v36 = vld [vmem:[%s689_s5 + $0x20] sm:$0xff]  ;;  %v212_v37 = vld [vmem:[%s689_s5 + $0x18] sm:$0xff]  ;;  %v211_v38 = vld [vmem:[%s689_s5 + $0x10] sm:$0xff] }
   0xe   :  { %387 = vmatprep.subr.mxu1 %v476_v1  ;;  %415 = vmatpush3.msra.mxu0 %v222_v22  ;;  %v210_v39 = vld [vmem:[%s689_s5 + $0x8] sm:$0xff]  ;;  %v209_v40 = vld [vmem:[%s689_s5] sm:$0xff] }
   0xf   :  { %388 = vmatpush3.msra.mxu1 %v124_v10  ;;  %416 = vmatprep.subr.mxu0 %v476_v1  ;;  %v328_v41 = vld [vmem:[%s688_s4] ss:$0 sm:$0xff]  ;;  %s318_s4 = sshll.u32 %s478_s29, 4  ;;  %s319_s4 = int_to_ptr.vmem [resolvable:$true] %s318_s4 }
  0x10   :  { %389 = vmatprep.subr.mxu1 %v476_v1  ;;  %417 = vmatpush3.msra.mxu0 %v221_v23  ;;  %v329_v46 = vld [vmem:[%s690_s6] ss:$0 sm:$0xff]  ;;  %s454_s30 = scalar_lea.vmem %s319_s4, 128  ;;  %p459_p1 = scmp.lt.s32.totalorder %s319_s4, %s319_s4 }
  0x11   :  { %390 = vmatpush3.msra.mxu1 %v123_v11  ;;  %418 = vmatprep.subr.mxu0 %v476_v1  ;;  %v330_v50 = vld [vmem:[%s691_s7] ss:$0 sm:$0xff]  ;;  %p455_p0 = scmp.ne.s32.totalorder %s319_s4, %s454_s30  ;;  %p460_p2 = scmp.lt.s32.totalorder %s454_s30, %s454_s30 }
  0x12   :  { %391 = vmatprep.subr.mxu1 %v476_v1  ;;  %419 = vmatpush3.msra.mxu0 %v220_v24 }
  0x13   :  { %392 = vmatpush3.msra.mxu1 %v122_v12  ;;  %420 = vmatprep.subr.mxu0 %v476_v1  ;;  %p461_p3 = por %p460_p2, %p459_p1 }
  0x14   :  { %393 = vmatprep.subr.mxu1 %v476_v1  ;;  %421 = vmatpush3.msra.mxu0 %v219_v25 }
  0x15   :  { %394 = vmatpush3.msra.mxu1 %v121_v13  ;;  %422 = vmatprep.subr.mxu0 %v476_v1  ;;  %p462_p4 = pnand %p461_p3, %p455_p0 }
  0x16   :  { %395 = vmatprep.subr.mxu1 %v476_v1  ;;  %423 = vmatpush3.msra.mxu0 %v218_v26 }
  0x17   :  { %396 = vmatpush3.msra.mxu1 %v120_v14  ;;  %424 = vmatprep.subr.mxu0 %v476_v1 }
  0x18   :  { %397 = vmatprep.subr.mxu1 %v476_v1  ;;  %425 = vmatpush3.msra.mxu0 %v217_v32 }
  0x19   :  { %398 = vmatpush3.msra.mxu1 %v119_v15  ;;  %426 = vmatprep.subr.mxu0 %v476_v1 }
  0x1a   :  { %399 = vmatprep.subr.mxu1 %v476_v1  ;;  %427 = vmatpush3.msra.mxu0 %v216_v33 }
  0x1b   :  { %400 = vmatpush3.msra.mxu1 %v118_v16  ;;  %428 = vmatprep.subr.mxu0 %v476_v1 }
  0x1c   :  { %401 = vmatprep.subr.mxu1 %v476_v1  ;;  %429 = vmatpush3.msra.mxu0 %v215_v34 }
  0x1d   :  { %402 = vmatpush3.msra.mxu1 %v117_v17  ;;  %430 = vmatprep.subr.mxu0 %v476_v1 }
  0x1e   :  { %403 = vmatprep.subr.mxu1 %v476_v1  ;;  %431 = vmatpush3.msra.mxu0 %v214_v35 }
  0x1f   :  { %404 = vmatpush3.msra.mxu1 %v116_v18  ;;  %432 = vmatprep.subr.mxu0 %v476_v1 }
  0x20   :  { %405 = vmatprep.subr.mxu1 %v476_v1  ;;  %433 = vmatpush3.msra.mxu0 %v213_v36 }
  0x21   :  { %406 = vmatpush3.msra.mxu1 %v115_v19  ;;  %434 = vmatprep.subr.mxu0 %v476_v1 }
  0x22   :  { %435 = vmatpush3.msra.mxu0 %v212_v37 }
  0x23   :  { %436 = vmatprep.subr.mxu0 %v476_v1 }
  0x24   :  { %437 = vmatpush3.msra.mxu0 %v211_v38 }
  0x25   :  { %438 = vmatprep.subr.mxu0 %v476_v1 }
  0x26   :  { %439 = vmatpush3.msra.mxu0 %v210_v39 }
  0x27   :  { %440 = vmatprep.subr.mxu0 %v476_v1 }
  0x28   :  { %441 = vmatpush3.msra.mxu0 %v209_v40 }
  0xc5   :  { %v110_v28 = vpop.f32.mrf.mxu0 }
  0xc6   :  { %v111_v29 = vadd.f32 %v326_v27, %v110_v28 }
  0xc7   :  { %v374_v30 = vpop.f32.mrf.mxu0 }
  0xc8   :  { %448 = vtanh.f32 %v111_v29 }
  0xd5   :  { %v449_v31 = vpop.eup %448 }
  0xd6   :  { %408 = vmatmul.mubr.f32.vlgmr.msra.gmra.mxu1 %v449_v31 }
 0x196   :  { %v204_v42 = vpop.f32.mrf.mxu1 }
 0x197   :  { %v205_v43 = vadd.f32 %v328_v41, %v204_v42 }
 0x198   :  { %v409_v44 = vpop.f32.mrf.mxu1 }
 0x199   :  { %450 = vtanh.f32 %v205_v43 }
 0x1a6   :  { %v451_v45 = vpop.eup %450 }
 0x1a7   :  { %443 = vmatmul.mubr.f32.vlgmr.msra.gmra.mxu0 %v451_v45 }
 0x267   :  { %v298_v47 = vpop.f32.mrf.mxu0 }
 0x268   :  { %v299_v48 = vadd.f32 %v329_v46, %v298_v47 }
 0x269   :  { %v444_v49 = vpop.f32.mrf.mxu0 }
 0x26a   :  { %452 = vtanh.f32 %v299_v48 }
 0x277   :  { %v453_v51 = vpop.eup %452 }
 0x278   :  { %v310_v52 = vmul.f32 %v453_v51, %v330_v50 }
 0x27a   :  { %311 = vst [vmem:[#allocation2] sm:$0xff] %v310_v52 }
 0x27b   :  { %465 = shalt.err (!%p462_p4)
}
 0x27c   :  { %321 = dma.vmem_to_hbm [thread:$0]  %s319_s4, 128, %s692_s8, [#allocation3]  }
 0x27d   :  { %474 = dma.done.wait [#allocation3], 128  }
 0x27e   :  { %475 = vsyncadd [#allocation3], 4294967168 }
 0x27f   :  { %325 = vsyncpa [#allocation3], 1 }

</bundles_post_ra>
